<compile_context>
chip_gen: v6e
topology: v6e:2x2x1
jax: 0.10.0
libtpu: 0.0.40
codegen_flags: <defaults>
</compile_context>

<pallas_src>
import functools

import jax
import jax.numpy as jnp
from jax.experimental import pallas as pl
from jax.experimental.pallas import tpu as pltpu

_VMEM_LIMIT_BYTES = 32 * 1024 * 1024   # safe on v5e/v6e (128 MiB phys) and v7x (64 MiB phys)
_TILE_VMEM_BUDGET = 12 * 1024 * 1024   # streams + intermediates for one batch tile


def _round_up(n, m):
    return ((n + m - 1) // m) * m


def _mlp_kernel(x_ref, w1_ref, b1_ref, w2_ref, b2_ref, w3_ref, b3_ref, o_ref):
    """relu(x@W1+b1) -> relu(.@W2+b2) -> .@W3+b3 on one batch tile.

    Weights/biases use constant index_maps so they stay VMEM-resident across
    the batch grid; only x and the output are streamed. Activations are cast
    to the weight dtype (bf16 if the params are stored bf16) right before each
    MXU dot; accumulation, bias add and ReLU stay in f32.
    """
    x = x_ref[...]

    h = jnp.dot(x.astype(w1_ref.dtype), w1_ref[...],
                preferred_element_type=jnp.float32)
    h = jnp.maximum(h + b1_ref[...], 0.0)

    h = jnp.dot(h.astype(w2_ref.dtype), w2_ref[...],
                preferred_element_type=jnp.float32)
    h = jnp.maximum(h + b2_ref[...], 0.0)

    h = jnp.dot(h.astype(w3_ref.dtype), w3_ref[...],
                preferred_element_type=jnp.float32)
    o_ref[...] = (h + b3_ref[...]).astype(o_ref.dtype)


def _batch_semantics(grid_b):
    """Batch-axis grid semantics: shard across TensorCores on v7x."""
    core_parallel = getattr(pltpu, "CORE_PARALLEL", None)
    try:
        kind = jax.devices()[0].device_kind.lower()
    except Exception:  # pragma: no cover - defensive
        kind = ""
    if core_parallel is not None and grid_b >= 2 and ("v7" in kind or "7x" in kind):
        return (core_parallel,)
    return ("parallel",)


def _pick_tile_b(B, bytes_per_row):
    """Largest batch tile that (a) keeps padding waste small, (b) fits VMEM."""
    cap = max(64, min(4096, (_TILE_VMEM_BUDGET // max(bytes_per_row, 1)) // 8 * 8))
    if B <= cap:
        return _round_up(B, 8)          # single grid step, <=7 padded rows
    for t in (4096, 2048, 1024, 512, 256, 128, 64):
        if t <= cap and (-B) % t <= max(B // 10, 64):
            return t
    return 64


@functools.partial(jax.jit, static_argnames=("tile_b",))
def _simple_fc_call(x, w1, b1, w2, b2, w3, b3, *, tile_b):
    B_p, indims = x.shape
    mid = w1.shape[1]
    outdims = w3.shape[1]
    grid_b = B_p // tile_b

    flops = 2 * B_p * (indims * mid + mid * mid + mid * outdims)
    bytes_accessed = (
        x.size * x.dtype.itemsize
        + w1.size * w1.dtype.itemsize + b1.size * b1.dtype.itemsize
        + w2.size * w2.dtype.itemsize + b2.size * b2.dtype.itemsize
        + w3.size * w3.dtype.itemsize + b3.size * b3.dtype.itemsize
        + B_p * outdims * x.dtype.itemsize
    )

    grid_spec = pltpu.PrefetchScalarGridSpec(
        num_scalar_prefetch=0,
        grid=(grid_b,),
        in_specs=[
            # x: streamed per batch tile at its NATIVE feature width
            pl.BlockSpec((tile_b, indims), lambda i: (i, 0)),
            # parameters: constant index_maps -> VMEM-resident across the grid
            pl.BlockSpec((indims, mid), lambda i: (0, 0)),   # W1
            pl.BlockSpec((1, mid), lambda i: (0, 0)),        # b1
            pl.BlockSpec((mid, mid), lambda i: (0, 0)),      # W2
            pl.BlockSpec((1, mid), lambda i: (0, 0)),        # b2
            pl.BlockSpec((mid, outdims), lambda i: (0, 0)),  # W3
            pl.BlockSpec((1, outdims), lambda i: (0, 0)),    # b3
        ],
        # output streamed at NATIVE outdims (no padded write + slice pass)
        out_specs=pl.BlockSpec((tile_b, outdims), lambda i: (i, 0)),
    )

    return pl.pallas_call(
        _mlp_kernel,
        out_shape=jax.ShapeDtypeStruct((B_p, outdims), x.dtype),
        grid_spec=grid_spec,
        compiler_params=pltpu.CompilerParams(
            dimension_semantics=_batch_semantics(grid_b),
            vmem_limit_bytes=_VMEM_LIMIT_BYTES,
        ),
        cost_estimate=pl.CostEstimate(
            flops=flops, transcendentals=0, bytes_accessed=bytes_accessed),
    )(x, w1, b1, w2, b2, w3, b3)


def simple_fc_forward(x, w1, b1, w2, b2, w3, b3):
    """Forward pass of simple_fc. Weights stored [in, out]; biases [1, out].

    No feature-dim padding is done: all feature axes use full-extent blocks.
    The batch is rounded up to a multiple of the batch tile (zero rows, so
    results are unaffected) and sliced back only when padding was needed.
    For best HBM traffic, store weights as bfloat16 (cast once at init) and/or
    pass x already in bfloat16; accumulation stays f32 either way.
    """
    B, indims = x.shape
    mid = w1.shape[1]
    outdims = w3.shape[1]

    bytes_per_row = (
        2 * (indims + outdims) * x.dtype.itemsize   # double-buffered x/out streams
        + 3 * 4 * mid                               # f32 intermediates
    )
    tile_b = _pick_tile_b(B, bytes_per_row)
    B_p = _round_up(B, tile_b)

    x_in = jnp.pad(x, ((0, B_p - B), (0, 0))) if B_p != B else x
    out = _simple_fc_call(x_in, w1, b1, w2, b2, w3, b3, tile_b=tile_b)
    return out[:B] if B_p != B else out


def init_params(key, indims, outdims):
    """Deterministic torch-Linear-style init: U(-1/sqrt(fan_in), 1/sqrt(fan_in))."""
    middledims = int(indims * 0.75)
    keys = jax.random.split(key, 6)

    def linear(kw, kb, fan_in, fan_out):
        bound = 1.0 / jnp.sqrt(fan_in)
        # stored as [in, out] (transposed vs torch's [out, in])
        w = jax.random.uniform(kw, (fan_in, fan_out), jnp.float32, -bound, bound)
        b = jax.random.uniform(kb, (1, fan_out), jnp.float32, -bound, bound)
        return w, b

    w1, b1 = linear(keys[0], keys[1], indims, middledims)
    w2, b2 = linear(keys[2], keys[3], middledims, middledims)
    w3, b3 = linear(keys[4], keys[5], middledims, outdims)
    return w1, b1, w2, b2, w3, b3


# TODO(synk): training path (MSELoss + Adam in `learn`) is out of scope for this
# forward-pass kernel; use jax.grad + optax around simple_fc_forward instead.

if __name__ == "__main__":
    indims, outdims = 32, 8          # middledims = int(32 * 0.75) = 24
    batch = 8

    key = jax.random.PRNGKey(0)
    kx, kp = jax.random.split(key)
    x = jax.random.normal(kx, (batch, indims), jnp.float32)
    w1, b1, w2, b2, w3, b3 = init_params(kp, indims, outdims)

    # plain-JAX reference
    h1 = jnp.maximum(x @ w1 + b1, 0.0)
    h2 = jnp.maximum(h1 @ w2 + b2, 0.0)
    ref = h2 @ w3 + b3

    # 1) f32 params: bit-tight parity with the reference.
    out_f32 = jax.block_until_ready(simple_fc_forward(x, w1, b1, w2, b2, w3, b3))
    assert out_f32.shape == (batch, outdims)
    assert jnp.allclose(out_f32, ref, atol=1e-5, rtol=1e-5)

    # 2) bf16-stored weights (one-time cast, outside the hot path): halves the
    #    parameter/weight-stream bytes and runs the MXU in native bf16 with f32
    #    accumulation. Looser tolerance due to bf16 rounding.
    w1b, w2b, w3b = (w.astype(jnp.bfloat16) for w in (w1, w2, w3))
    out_bf16 = jax.block_until_ready(
        simple_fc_forward(x, w1b, b1, w2b, b2, w3b, b3))
    assert out_bf16.shape == (batch, outdims)
    assert jnp.allclose(out_bf16, ref, atol=5e-2, rtol=5e-2)

    # 3) non-multiple-of-8 batch exercises the row-padding + slice path.
    x_odd = jax.random.normal(jax.random.PRNGKey(1), (13, indims), jnp.float32)
    ref_odd = jnp.maximum(jnp.maximum(x_odd @ w1 + b1, 0.0) @ w2 + b2, 0.0) @ w3 + b3
    out_odd = jax.block_until_ready(simple_fc_forward(x_odd, w1, b1, w2, b2, w3, b3))
    assert out_odd.shape == (13, outdims)
    assert jnp.allclose(out_odd, ref_odd, atol=1e-5, rtol=1e-5)

    print("KERNEL_OK")
</pallas_src>

<mosaic_0001>
module attributes {stable_mosaic.version = 11 : i64} {
  func.func @_mlp_kernel(%arg0: i32, %arg1: memref<8x32xf32, #tpu.memory_space<vmem>>, %arg2: memref<32x24xf32, #tpu.memory_space<vmem>>, %arg3: memref<1x24xf32, #tpu.memory_space<vmem>>, %arg4: memref<24x24xf32, #tpu.memory_space<vmem>>, %arg5: memref<1x24xf32, #tpu.memory_space<vmem>>, %arg6: memref<24x8xf32, #tpu.memory_space<vmem>>, %arg7: memref<1x8xf32, #tpu.memory_space<vmem>>, %arg8: memref<8x8xf32, #tpu.memory_space<vmem>>) attributes {dimension_semantics = [#tpu.dimension_semantics<parallel>], iteration_bounds = array<i64: 1>, scalar_prefetch = 0 : i64, scratch_operands = 0 : i64, tpu.core_type = #tpu.core_type<tc>, window_params = [{transform_indices = @transform_0, window_bounds = array<i64: 8, 32>}, {pipeline_mode = #tpu.pipeline_mode<synchronous>, transform_indices = @transform_1, window_bounds = array<i64: 32, 24>}, {pipeline_mode = #tpu.pipeline_mode<synchronous>, transform_indices = @transform_2, window_bounds = array<i64: 1, 24>}, {pipeline_mode = #tpu.pipeline_mode<synchronous>, transform_indices = @transform_3, window_bounds = array<i64: 24, 24>}, {pipeline_mode = #tpu.pipeline_mode<synchronous>, transform_indices = @transform_4, window_bounds = array<i64: 1, 24>}, {pipeline_mode = #tpu.pipeline_mode<synchronous>, transform_indices = @transform_5, window_bounds = array<i64: 24, 8>}, {pipeline_mode = #tpu.pipeline_mode<synchronous>, transform_indices = @transform_6, window_bounds = array<i64: 1, 8>}, {transform_indices = @transform_7, window_bounds = array<i64: 8, 8>}]} {
    %c0 = arith.constant 0 : index
    %c0_0 = arith.constant 0 : index
    %0 = vector.load %arg1[%c0, %c0_0] : memref<8x32xf32, #tpu.memory_space<vmem>>, vector<8x32xf32>
    %c0_1 = arith.constant 0 : index
    %c0_2 = arith.constant 0 : index
    %1 = vector.load %arg2[%c0_1, %c0_2] : memref<32x24xf32, #tpu.memory_space<vmem>>, vector<32x24xf32>
    %cst = arith.constant dense<0.000000e+00> : vector<8x24xf32>
    %2 = tpu.matmul %0, %1, %cst {dimension_numbers = #tpu.dot_dimension_numbers<[1], [0], [0], [1], [0, 0, 1, 1], [], []>} : vector<8x32xf32>, vector<32x24xf32>, vector<8x24xf32> -> vector<8x24xf32>
    %c0_3 = arith.constant 0 : index
    %c0_4 = arith.constant 0 : index
    %3 = vector.load %arg3[%c0_3, %c0_4] : memref<1x24xf32, #tpu.memory_space<vmem>>, vector<1x24xf32>
    %4 = vector.broadcast %3 : vector<1x24xf32> to vector<8x24xf32>
    %5 = arith.addf %2, %4 : vector<8x24xf32>
    %cst_5 = arith.constant 0.000000e+00 : f32
    %6 = vector.broadcast %cst_5 : f32 to vector<8x24xf32>
    %7 = arith.maximumf %5, %6 : vector<8x24xf32>
    %c0_6 = arith.constant 0 : index
    %c0_7 = arith.constant 0 : index
    %8 = vector.load %arg4[%c0_6, %c0_7] : memref<24x24xf32, #tpu.memory_space<vmem>>, vector<24x24xf32>
    %cst_8 = arith.constant dense<0.000000e+00> : vector<8x24xf32>
    %9 = tpu.matmul %7, %8, %cst_8 {dimension_numbers = #tpu.dot_dimension_numbers<[1], [0], [0], [1], [0, 0, 1, 1], [], []>} : vector<8x24xf32>, vector<24x24xf32>, vector<8x24xf32> -> vector<8x24xf32>
    %c0_9 = arith.constant 0 : index
    %c0_10 = arith.constant 0 : index
    %10 = vector.load %arg5[%c0_9, %c0_10] : memref<1x24xf32, #tpu.memory_space<vmem>>, vector<1x24xf32>
    %11 = vector.broadcast %10 : vector<1x24xf32> to vector<8x24xf32>
    %12 = arith.addf %9, %11 : vector<8x24xf32>
    %cst_11 = arith.constant 0.000000e+00 : f32
    %13 = vector.broadcast %cst_11 : f32 to vector<8x24xf32>
    %14 = arith.maximumf %12, %13 : vector<8x24xf32>
    %c0_12 = arith.constant 0 : index
    %c0_13 = arith.constant 0 : index
    %15 = vector.load %arg6[%c0_12, %c0_13] : memref<24x8xf32, #tpu.memory_space<vmem>>, vector<24x8xf32>
    %cst_14 = arith.constant dense<0.000000e+00> : vector<8x8xf32>
    %16 = tpu.matmul %14, %15, %cst_14 {dimension_numbers = #tpu.dot_dimension_numbers<[1], [0], [0], [1], [0, 0, 1, 1], [], []>} : vector<8x24xf32>, vector<24x8xf32>, vector<8x8xf32> -> vector<8x8xf32>
    %c0_15 = arith.constant 0 : index
    %c0_16 = arith.constant 0 : index
    %17 = vector.load %arg7[%c0_15, %c0_16] : memref<1x8xf32, #tpu.memory_space<vmem>>, vector<1x8xf32>
    %18 = vector.broadcast %17 : vector<1x8xf32> to vector<8x8xf32>
    %19 = arith.addf %16, %18 : vector<8x8xf32>
    %c0_17 = arith.constant 0 : index
    %c0_18 = arith.constant 0 : index
    %20 = vector.load %arg8[%c0_17, %c0_18] : memref<8x8xf32, #tpu.memory_space<vmem>>, vector<8x8xf32>
    tpu.vector_store %arg8[%c0_17, %c0_18], %19 {strides = array<i32>} : memref<8x8xf32, #tpu.memory_space<vmem>>, vector<8x8xf32>,
    return
  }
  func.func @transform_0(%arg0: i32) -> (i32, i32) {
    %c0_i32 = arith.constant 0 : i32
    %c0_i32_0 = arith.constant 0 : i32
    return %arg0, %c0_i32 : i32, i32
  }
  func.func @transform_1(%arg0: i32) -> (i32, i32) {
    %c0_i32 = arith.constant 0 : i32
    %c0_i32_0 = arith.constant 0 : i32
    %c0_i32_1 = arith.constant 0 : i32
    return %c0_i32, %c0_i32_0 : i32, i32
  }
  func.func @transform_2(%arg0: i32) -> (i32, i32) {
    %c0_i32 = arith.constant 0 : i32
    %c0_i32_0 = arith.constant 0 : i32
    %c0_i32_1 = arith.constant 0 : i32
    return %c0_i32, %c0_i32_0 : i32, i32
  }
  func.func @transform_3(%arg0: i32) -> (i32, i32) {
    %c0_i32 = arith.constant 0 : i32
    %c0_i32_0 = arith.constant 0 : i32
    %c0_i32_1 = arith.constant 0 : i32
    return %c0_i32, %c0_i32_0 : i32, i32
  }
  func.func @transform_4(%arg0: i32) -> (i32, i32) {
    %c0_i32 = arith.constant 0 : i32
    %c0_i32_0 = arith.constant 0 : i32
    %c0_i32_1 = arith.constant 0 : i32
    return %c0_i32, %c0_i32_0 : i32, i32
  }
  func.func @transform_5(%arg0: i32) -> (i32, i32) {
    %c0_i32 = arith.constant 0 : i32
    %c0_i32_0 = arith.constant 0 : i32
    %c0_i32_1 = arith.constant 0 : i32
    return %c0_i32, %c0_i32_0 : i32, i32
  }
  func.func @transform_6(%arg0: i32) -> (i32, i32) {
    %c0_i32 = arith.constant 0 : i32
    %c0_i32_0 = arith.constant 0 : i32
    %c0_i32_1 = arith.constant 0 : i32
    return %c0_i32, %c0_i32_0 : i32, i32
  }
  func.func @transform_7(%arg0: i32) -> (i32, i32) {
    %c0_i32 = arith.constant 0 : i32
    %c0_i32_0 = arith.constant 0 : i32
    return %arg0, %c0_i32 : i32, i32
  }
}

</mosaic_0001>

<bundles_post_ra>
// kernel: _simple_fc_call.1
= control target key start
LH: loop header
LB: loop body
LE: loop exit
PB: predicated region body
PF: predicated region fallthrough
CT: control target
= control target key end

     0   :  { %v371_v1 = vmov 0.0   ;;  %vm372_vm0 = vmmov 0   ;;  %s464_s0 = inlined_call_operand.vmem [shape: f32[8,32], index: 0, kind: input, shape index: {}]   ;;  %s465_s1 = inlined_call_operand.vmem [shape: f32[32,24], index: 1, kind: input, shape index: {}]   ;;  %s466_s2 = inlined_call_operand.vmem [shape: f32[1,24], index: 2, kind: input, shape index: {}]   ;;  %s467_s3 = inlined_call_operand.vmem [shape: f32[24,24], index: 3, kind: input, shape index: {}]   ;;  %s468_s4 = inlined_call_operand.vmem [shape: f32[1,24], index: 4, kind: input, shape index: {}]   ;;  %s469_s5 = inlined_call_operand.vmem [shape: f32[24,8], index: 5, kind: input, shape index: {}]   ;;  %s470_s6 = inlined_call_operand.vmem [shape: f32[1,8], index: 6, kind: input, shape index: {}]   ;;  %s471_s7 = inlined_call_operand.hbm [shape: f32[8,8], index: 7, kind: output, shape index: {}]  }
   0x1   :  { %v31_v0 = vld [vmem:[%s465_s1 + $0x18] sm:$0xff]  ;;  %317 = vmatprep.subr.mxu0 %v371_v1  ;;  %v30_v2 = vld [vmem:[%s465_s1 + $0x10] sm:$0xff]  ;;  %325 = vmatprep.mubr.msk.f32.mxu0 %vm372_vm0, %v371_v1 }
   0x2   :  { %318 = vmatpush3.msra.mxu0 %v31_v0  ;;  %328 = vmatprep.subr.mxu1 %v371_v1 }
   0x3   :  { %12 = vsyncpa [#allocation3], 0  ;;  %319 = vmatprep.subr.mxu0 %v371_v1  ;;  %v29_v3 = vld [vmem:[%s465_s1 + $0x8] sm:$0xff]  ;;  %334 = vmatprep.mubr.msk.f32.mxu1 %vm372_vm0, %v371_v1  ;;  %v28_v4 = vld [vmem:[%s465_s1] sm:$0xff]  ;;  %vm39_vm1 = vcmask 261120   ;;  %vm124_vm2 = vcmask 195584  }
   0x4   :  { %320 = vmatpush3.msra.mxu0 %v30_v2  ;;  %v27_v5 = vld [vmem:[%s464_s0] sm:$0xff]  ;;  %v116_v6 = vld [vmem:[%s467_s3 + $0x10] sm:$0xff]  ;;  %v115_v7 = vld [vmem:[%s467_s3 + $0x8] sm:$0xff]  ;;  %s373_s25 = smov [#allocation2]   ;;  %vm282_vm3 = vcmask 64512  }
   0x5   :  { %321 = vmatprep.subr.mxu0 %v371_v1  ;;  %329 = vmatpush3.msra.mxu1 %v116_v6  ;;  %v114_v8 = vld [vmem:[%s467_s3] sm:$0xff]  ;;  %v201_v14 = vld [vmem:[%s469_s5 + $0x10] sm:$0xff]  ;;  %v200_v15 = vld [vmem:[%s469_s5 + $0x8] sm:$0xff]  ;;  %s290_s26 = sshll.u32 %s373_s25, 4  ;;  %s291_s26 = int_to_ptr.vmem [resolvable:$true] %s290_s26 }
   0x6   :  { %322 = vmatpush3.msra.mxu0 %v29_v3  ;;  %330 = vmatprep.subr.mxu1 %v371_v1  ;;  %v298_v9 = vld [vmem:[%s466_s2] ss:$0 sm:$0xff]  ;;  %p354_p1 = scmp.lt.s32.totalorder %s291_s26, %s291_s26 }
   0x7   :  { %323 = vmatprep.subr.mxu0 %v371_v1  ;;  %331 = vmatpush3.msra.mxu1 %v115_v7  ;;  %v199_v16 = vld [vmem:[%s469_s5] sm:$0xff]  ;;  %s349_s5 = scalar_lea.vmem %s291_s26, 128 }
   0x8   :  { %324 = vmatpush3.msra.mxu0 %v28_v4  ;;  %332 = vmatprep.subr.mxu1 %v371_v1  ;;  %v300_v17 = vld [vmem:[%s468_s4] ss:$0 sm:$0xff]  ;;  %p350_p0 = scmp.ne.s32.totalorder %s291_s26, %s349_s5  ;;  %p355_p2 = scmp.lt.s32.totalorder %s349_s5, %s349_s5 }
   0x9   :  { %326 = vmatmul.mubr.msk.f32.vlgmr.msra.gmra.mxu0 %vm39_vm1, %v27_v5  ;;  %333 = vmatpush3.msra.mxu1 %v114_v8  ;;  %v302_v22 = vld [vmem:[%s470_s6] ss:$0 sm:$0xff] }
   0xa   :  { %337 = vmatprep.subr.mxu1 %v371_v1  ;;  %p356_p3 = por %p355_p2, %p354_p1 }
   0xc   :  { %p357_p4 = pnand %p356_p3, %p350_p0 }
  0xc9   :  { %v109_v10 = vpop.f32.mrf.mxu0 }
  0xca   :  { %v110_v11 = vadd.f32 %v298_v9, %v109_v10 }
  0xcb   :  { %v327_v12 = vpop.f32.mrf.mxu0 }
  0xcc   :  { %v113_v13 = vmax.f32 %v110_v11, 0.0 }
  0xce   :  { %335 = vmatmul.mubr.msk.f32.vlgmr.msra.gmra.mxu1 %vm124_vm2, %v113_v13 }
  0xcf   :  { %343 = vmatprep.mubr.msk.f32.mxu1 %vm372_vm0, %v371_v1  ;;  %338 = vmatpush3.msra.mxu1 %v201_v14 }
  0xd0   :  { %339 = vmatprep.subr.mxu1 %v371_v1 }
  0xd1   :  { %340 = vmatpush3.msra.mxu1 %v200_v15 }
  0xd2   :  { %341 = vmatprep.subr.mxu1 %v371_v1 }
  0xd3   :  { %342 = vmatpush3.msra.mxu1 %v199_v16 }
 0x18e   :  { %v194_v18 = vpop.f32.mrf.mxu1 }
 0x18f   :  { %v195_v19 = vadd.f32 %v300_v17, %v194_v18 }
 0x190   :  { %v336_v20 = vpop.f32.mrf.mxu1 }
 0x191   :  { %v198_v21 = vmax.f32 %v195_v19, 0.0 }
 0x193   :  { %344 = vmatmul.mubr.msk.f32.vlgmr.msra.gmra.mxu1 %vm124_vm2, %v198_v21 }
 0x253   :  { %v278_v23 = vpop.f32.mrf.mxu1 }
 0x254   :  { %v279_v24 = vadd.f32 %v302_v22, %v278_v23 }
 0x255   :  { %v345_v25 = vpop.f32.mrf.mxu1 }
 0x256   :  { %283 = vst.msk [vmem:[#allocation2] sm:$0xff] %vm282_vm3, %v279_v24 }
 0x257   :  { %360 = shalt.err (!%p357_p4)
}
 0x258   :  { %293 = dma.vmem_to_hbm [thread:$0]  %s291_s26, 128, %s471_s7, [#allocation3]  }
 0x259   :  { %369 = dma.done.wait [#allocation3], 128  }
 0x25a   :  { %370 = vsyncadd [#allocation3], 4294967168 }
 0x25b   :  { %297 = vsyncpa [#allocation3], 1 }

</bundles_post_ra>
